<compile_context>
chip_gen: v7x
topology: tpu7x:2x2x1
jax: 0.10.0
libtpu: 0.0.40
codegen_flags: <defaults>
</compile_context>

<pallas_src>
import functools

import numpy as np
import jax
import jax.numpy as jnp
from jax.experimental import pallas as pl
from jax.experimental.pallas import tpu as pltpu

KERNEL_SIZE = 25  # fixed in the PyTorch Model.__init__


def _round_up(x, m):
    return (x + m - 1) // m * m


@functools.lru_cache(maxsize=None)
def _decomp_matrix(L, kernel_size=KERNEL_SIZE):
    """A[L, L] such that (rows @ A)[n, t] == moving mean with replicate pad."""
    pad = (kernel_size - 1) // 2
    A = np.zeros((L, L), np.float32)
    inv_k = 1.0 / kernel_size
    for t in range(L):
        for j in range(kernel_size):
            src = min(max(t + j - pad, 0), L - 1)
            A[src, t] += inv_k
    return A


# ----------------------------------------------------------------------------
# Kernel: one (or two) VMEM-resident MLP(s) applied to a [TILE_N, L_pad] row
# tile; branch results are summed.  The moving-average decomposition is
# already folded into the first-layer weights, and (when fused) the seasonal
# and trend MLPs are already merged into a single block-diagonal MLP.
# ----------------------------------------------------------------------------
def _make_mlp_sum_kernel(n_lin, n_branches):
    def kernel(*refs):
        rows_ref = refs[0]
        out_ref = refs[-1]
        wb = refs[1:-1]                         # n_branches * n_lin * (W, b)
        x = rows_ref[...]
        acc = None
        for br in range(n_branches):
            base = br * 2 * n_lin
            h = x
            for i in range(n_lin):
                w = wb[base + 2 * i][...]
                b = wb[base + 2 * i + 1][...].astype(jnp.float32)
                h = jnp.dot(h.astype(w.dtype), w,
                            preferred_element_type=jnp.float32) + b
                if i < n_lin - 1:               # ReLU after all but last Linear
                    h = jnp.maximum(h, 0.0)
            acc = h if acc is None else acc + h
        out_ref[...] = acc.astype(out_ref.dtype)

    return kernel


# ----------------------------------------------------------------------------
# Parameter init (PyTorch nn.Linear-style uniform); W as [in,out], b as [1,out]
# ----------------------------------------------------------------------------
def init_mlp_params(key, seq_len, hid_len, hid_layers, pred_len):
    dims = [(seq_len, hid_len)] + [(hid_len, hid_len)] * hid_layers + [(hid_len, pred_len)]
    params = []
    for (fan_in, fan_out) in dims:
        key, kw, kb = jax.random.split(key, 3)
        bound = 1.0 / jnp.sqrt(fan_in)
        w = jax.random.uniform(kw, (fan_in, fan_out), jnp.float32, -bound, bound)
        b = jax.random.uniform(kb, (1, fan_out), jnp.float32, -bound, bound)
        params.append((w, b))
    return params


# ----------------------------------------------------------------------------
# Model forward (individual = False)
# ----------------------------------------------------------------------------
@functools.partial(jax.jit, static_argnames=("pred_len", "compute_dtype", "tile_n",
                                             "use_buffered", "max_fused_hidden"))
def dmlp_forward(x, seasonal_params, trend_params, pred_len,
                 compute_dtype=jnp.float32, tile_n=1024,
                 use_buffered=True, max_fused_hidden=256):
    """x: [B, seq_len, C] -> [B, pred_len, C]"""
    B, L, C = x.shape
    N = B * C
    n_lin = len(seasonal_params)
    H = seasonal_params[0][0].shape[1]

    L_pad = _round_up(L, 128)
    P_pad = _round_up(pred_len, 128)

    # ---- fold moving-average decomposition into the first-layer weights
    A = jnp.asarray(_decomp_matrix(L))              # rows @ A = moving mean
    I = jnp.eye(L, dtype=jnp.float32)

    def folded(params, M):
        (w0, b0) = params[0]
        return [(M @ w0, b0)] + [(w, b) for (w, b) in params[1:]]

    s_par = folded(seasonal_params, I - A)          # seasonal = rows @ (I - A)
    t_par = folded(trend_params, A)                 # trend    = rows @ A

    def place(shape, blocks):
        w = jnp.zeros(shape, jnp.float32)
        for (r0, c0, v) in blocks:
            w = w.at[r0:r0 + v.shape[0], c0:c0 + v.shape[1]].set(v)
        return w

    # ---- fuse the two branches into ONE block-diagonal MLP when the fused
    #      hidden width still fills (not exceeds) a 256-wide MXU pass.
    fuse = (2 * H) <= max_fused_hidden
    if fuse:
        Hf = _round_up(2 * H, 128)
        branch = []
        w_s, b_s = s_par[0]; w_t, b_t = t_par[0]
        branch.append((place((L_pad, Hf), [(0, 0, w_s), (0, H, w_t)]),
                       place((1, Hf), [(0, 0, b_s), (0, H, b_t)])))
        for i in range(1, n_lin - 1):
            w_s, b_s = s_par[i]; w_t, b_t = t_par[i]
            branch.append((place((Hf, Hf), [(0, 0, w_s), (H, H, w_t)]),
                           place((1, Hf), [(0, 0, b_s), (0, H, b_t)])))
        w_s, b_s = s_par[-1]; w_t, b_t = t_par[-1]
        branch.append((place((Hf, P_pad), [(0, 0, w_s), (H, 0, w_t)]),
                       place((1, P_pad), [(0, 0, b_s + b_t)])))
        branches = [branch]
    else:
        H_pad = _round_up(H, 128)

        def pad_branch(par):
            out = []
            w0, b0 = par[0]
            out.append((place((L_pad, H_pad), [(0, 0, w0)]),
                        place((1, H_pad), [(0, 0, b0)])))
            for i in range(1, n_lin - 1):
                wi, bi = par[i]
                out.append((place((H_pad, H_pad), [(0, 0, wi)]),
                            place((1, H_pad), [(0, 0, bi)])))
            wl, bl = par[-1]
            out.append((place((H_pad, P_pad), [(0, 0, wl)]),
                        place((1, P_pad), [(0, 0, bl)])))
            return out

        branches = [pad_branch(s_par), pad_branch(t_par)]

    # matmul inputs in compute dtype (bf16 fast path on v6e/v7x), biases f32
    branches = [[(w.astype(compute_dtype), b.astype(jnp.float32)) for (w, b) in br]
                for br in branches]
    flat = [a for br in branches for wb in br for a in wb]

    # ---- row tiling: >= 2 grid steps when N allows (v7x dual-TC sharding),
    #      rounded to the compute dtype's sublane packing.
    row_align = max(8, 32 // np.dtype(compute_dtype).itemsize)
    half = _round_up(max(1, (N + 1) // 2), row_align)
    tile_n_al = _round_up(tile_n, row_align)
    TILE_N = max(row_align, min(tile_n_al, half))
    N_pad = _round_up(N, TILE_N)

    # ---- rows layout: [B, L, C] -> [B*C, L_pad] (seq axis lane-dense)
    #      (the transpose remains a wrapper-side XLA op; see notes)
    rows = jnp.transpose(x, (0, 2, 1)).reshape(N, L).astype(compute_dtype)
    rows = jnp.pad(rows, ((0, N_pad - N), (0, L_pad - L)))

    # ---- specs
    row_spec = pl.BlockSpec((TILE_N, L_pad), lambda i: (i, 0))
    out_spec = pl.BlockSpec((TILE_N, P_pad), lambda i: (i, 0))

    def const_spec(shape):
        if use_buffered:
            # weights never change across the grid -> single VMEM buffer
            return pl.BlockSpec(shape, lambda i: (0, 0),
                                pipeline_mode=pl.Buffered(1))
        return pl.BlockSpec(shape, lambda i: (0, 0))

    w_specs = [const_spec(a.shape) for a in flat]

    # ---- VMEM budget: weights (resident) + double-buffered row/out tiles
    weight_bytes = sum(int(a.size) * a.dtype.itemsize for a in flat)
    row_tile_bytes = TILE_N * L_pad * np.dtype(compute_dtype).itemsize
    out_tile_bytes = TILE_N * P_pad * x.dtype.itemsize
    weight_bufs = 1 if use_buffered else 2
    vmem_need = (weight_bufs * weight_bytes
                 + 2 * (row_tile_bytes + out_tile_bytes)
                 + (16 << 20))                      # compiler scratch headroom
    try:
        vmem_phys = int(pltpu.get_tpu_info().vmem_capacity_bytes)
    except Exception:
        vmem_phys = 64 << 20                        # v7x is the smallest per-TC
    vmem_limit = int(min(max(vmem_need, 32 << 20), int(vmem_phys * 0.85)))

    # ---- cost estimate so XLA overlaps the surrounding transpose/pad/slice
    flops = 2 * N_pad * sum(int(w.shape[0]) * int(w.shape[1])
                            for br in branches for (w, _) in br)
    bytes_accessed = (N_pad * L_pad * np.dtype(compute_dtype).itemsize
                      + weight_bytes
                      + N_pad * P_pad * x.dtype.itemsize)
    cost = pl.CostEstimate(flops=flops, transcendentals=0,
                           bytes_accessed=bytes_accessed)

    out = pl.pallas_call(
        _make_mlp_sum_kernel(n_lin, len(branches)),
        out_shape=jax.ShapeDtypeStruct((N_pad, P_pad), x.dtype),
        grid_spec=pltpu.PrefetchScalarGridSpec(
            num_scalar_prefetch=0,
            grid=(N_pad // TILE_N,),
            in_specs=[row_spec] + w_specs,
            out_specs=out_spec,
        ),
        compiler_params=pltpu.CompilerParams(
            dimension_semantics=("parallel",),
            vmem_limit_bytes=vmem_limit,
        ),
        cost_estimate=cost,
    )(rows, *flat)

    out = out[:N, :pred_len]
    return jnp.transpose(out.reshape(B, C, pred_len), (0, 2, 1))


# ----------------------------------------------------------------------------
# Pure-JAX reference (original decomposition path; for correctness check only)
# ----------------------------------------------------------------------------
def ref_forward(x, seasonal_params, trend_params, pred_len):
    B, L, C = x.shape
    pad = (KERNEL_SIZE - 1) // 2
    front = jnp.repeat(x[:, :1, :], pad, axis=1)
    end = jnp.repeat(x[:, -1:, :], pad, axis=1)
    xpad = jnp.concatenate([front, x, end], axis=1)
    mean = jnp.stack([xpad[:, k:k + L, :] for k in range(KERNEL_SIZE)], 0).mean(0)
    res = x - mean
    seasonal = jnp.transpose(res, (0, 2, 1)).reshape(B * C, L)
    trend = jnp.transpose(mean, (0, 2, 1)).reshape(B * C, L)

    def mlp(h, params):
        n = len(params)
        for i, (w, b) in enumerate(params):
            h = h @ w + b
            if i < n - 1:
                h = jnp.maximum(h, 0.0)
        return h

    out = mlp(seasonal, seasonal_params) + mlp(trend, trend_params)
    return jnp.transpose(out.reshape(B, C, pred_len), (0, 2, 1))


if __name__ == "__main__":
    # small config consistent with the module
    B, seq_len, enc_in = 2, 16, 4
    pred_len, hid_len, hid_layers = 8, 32, 2

    key = jax.random.PRNGKey(0)
    kx, ks, kt = jax.random.split(key, 3)
    x = jax.random.normal(kx, (B, seq_len, enc_in), jnp.float32)

    seasonal_params = init_mlp_params(ks, seq_len, hid_len, hid_layers, pred_len)
    trend_params = init_mlp_params(kt, seq_len, hid_len, hid_layers, pred_len)

    y_ref = ref_forward(x, seasonal_params, trend_params, pred_len)

    def run(compute_dtype):
        try:
            y = dmlp_forward(x, seasonal_params, trend_params, pred_len=pred_len,
                             compute_dtype=compute_dtype, use_buffered=True)
            return jax.block_until_ready(y)
        except Exception:
            # pipeline_mode=pl.Buffered(1) unsupported on this jax version:
            # fall back to default double-buffered weight specs.
            y = dmlp_forward(x, seasonal_params, trend_params, pred_len=pred_len,
                             compute_dtype=compute_dtype, use_buffered=False)
            return jax.block_until_ready(y)

    # f32 path (module-exact semantics)
    y = run(jnp.float32)
    assert y.shape == (B, pred_len, enc_in), y.shape
    assert jnp.allclose(y, y_ref, rtol=1e-4, atol=1e-4), float(jnp.abs(y - y_ref).max())

    # bf16 matmul-input fast path (v6e/v7x); f32 accumulation, loose tolerance
    y_bf16 = run(jnp.bfloat16)
    assert y_bf16.shape == (B, pred_len, enc_in), y_bf16.shape
    assert float(jnp.max(jnp.abs(y_bf16 - y_ref))) < 0.1, \
        float(jnp.max(jnp.abs(y_bf16 - y_ref)))

    print("KERNEL_OK")
</pallas_src>

<mosaic_0001>
module attributes {stable_mosaic.version = 11 : i64} {
  func.func @kernel(%arg0: i32, %arg1: memref<8x128xf32, #tpu.memory_space<vmem>>, %arg2: memref<128x128xf32, #tpu.memory_space<vmem>>, %arg3: memref<1x128xf32, #tpu.memory_space<vmem>>, %arg4: memref<128x128xf32, #tpu.memory_space<vmem>>, %arg5: memref<1x128xf32, #tpu.memory_space<vmem>>, %arg6: memref<128x128xf32, #tpu.memory_space<vmem>>, %arg7: memref<1x128xf32, #tpu.memory_space<vmem>>, %arg8: memref<128x128xf32, #tpu.memory_space<vmem>>, %arg9: memref<1x128xf32, #tpu.memory_space<vmem>>, %arg10: memref<8x128xf32, #tpu.memory_space<vmem>>) attributes {dimension_semantics = [#tpu.dimension_semantics<parallel>], iteration_bounds = array<i64: 1>, scalar_prefetch = 0 : i64, scratch_operands = 0 : i64, tpu.core_type = #tpu.core_type<tc>, window_params = [{transform_indices = @transform_0, window_bounds = array<i64: 8, 128>}, {pipeline_mode = #tpu.pipeline_mode<synchronous>, transform_indices = @transform_1, window_bounds = array<i64: 128, 128>}, {pipeline_mode = #tpu.pipeline_mode<synchronous>, transform_indices = @transform_2, window_bounds = array<i64: 1, 128>}, {pipeline_mode = #tpu.pipeline_mode<synchronous>, transform_indices = @transform_3, window_bounds = array<i64: 128, 128>}, {pipeline_mode = #tpu.pipeline_mode<synchronous>, transform_indices = @transform_4, window_bounds = array<i64: 1, 128>}, {pipeline_mode = #tpu.pipeline_mode<synchronous>, transform_indices = @transform_5, window_bounds = array<i64: 128, 128>}, {pipeline_mode = #tpu.pipeline_mode<synchronous>, transform_indices = @transform_6, window_bounds = array<i64: 1, 128>}, {pipeline_mode = #tpu.pipeline_mode<synchronous>, transform_indices = @transform_7, window_bounds = array<i64: 128, 128>}, {pipeline_mode = #tpu.pipeline_mode<synchronous>, transform_indices = @transform_8, window_bounds = array<i64: 1, 128>}, {transform_indices = @transform_9, window_bounds = array<i64: 8, 128>}]} {
    %c0 = arith.constant 0 : index
    %c0_0 = arith.constant 0 : index
    %0 = vector.load %arg1[%c0, %c0_0] : memref<8x128xf32, #tpu.memory_space<vmem>>, vector<8x128xf32>
    %c0_1 = arith.constant 0 : index
    %c0_2 = arith.constant 0 : index
    %1 = vector.load %arg2[%c0_1, %c0_2] : memref<128x128xf32, #tpu.memory_space<vmem>>, vector<128x128xf32>
    %c0_3 = arith.constant 0 : index
    %c0_4 = arith.constant 0 : index
    %2 = vector.load %arg3[%c0_3, %c0_4] : memref<1x128xf32, #tpu.memory_space<vmem>>, vector<1x128xf32>
    %cst = arith.constant dense<0.000000e+00> : vector<8x128xf32>
    %3 = tpu.matmul %0, %1, %cst {dimension_numbers = #tpu.dot_dimension_numbers<[1], [0], [0], [1], [0, 0, 1, 1], [], []>} : vector<8x128xf32>, vector<128x128xf32>, vector<8x128xf32> -> vector<8x128xf32>
    %4 = vector.broadcast %2 : vector<1x128xf32> to vector<8x128xf32>
    %5 = arith.addf %3, %4 : vector<8x128xf32>
    %cst_5 = arith.constant 0.000000e+00 : f32
    %6 = vector.broadcast %cst_5 : f32 to vector<8x128xf32>
    %7 = arith.maximumf %5, %6 : vector<8x128xf32>
    %c0_6 = arith.constant 0 : index
    %c0_7 = arith.constant 0 : index
    %8 = vector.load %arg4[%c0_6, %c0_7] : memref<128x128xf32, #tpu.memory_space<vmem>>, vector<128x128xf32>
    %c0_8 = arith.constant 0 : index
    %c0_9 = arith.constant 0 : index
    %9 = vector.load %arg5[%c0_8, %c0_9] : memref<1x128xf32, #tpu.memory_space<vmem>>, vector<1x128xf32>
    %cst_10 = arith.constant dense<0.000000e+00> : vector<8x128xf32>
    %10 = tpu.matmul %7, %8, %cst_10 {dimension_numbers = #tpu.dot_dimension_numbers<[1], [0], [0], [1], [0, 0, 1, 1], [], []>} : vector<8x128xf32>, vector<128x128xf32>, vector<8x128xf32> -> vector<8x128xf32>
    %11 = vector.broadcast %9 : vector<1x128xf32> to vector<8x128xf32>
    %12 = arith.addf %10, %11 : vector<8x128xf32>
    %cst_11 = arith.constant 0.000000e+00 : f32
    %13 = vector.broadcast %cst_11 : f32 to vector<8x128xf32>
    %14 = arith.maximumf %12, %13 : vector<8x128xf32>
    %c0_12 = arith.constant 0 : index
    %c0_13 = arith.constant 0 : index
    %15 = vector.load %arg6[%c0_12, %c0_13] : memref<128x128xf32, #tpu.memory_space<vmem>>, vector<128x128xf32>
    %c0_14 = arith.constant 0 : index
    %c0_15 = arith.constant 0 : index
    %16 = vector.load %arg7[%c0_14, %c0_15] : memref<1x128xf32, #tpu.memory_space<vmem>>, vector<1x128xf32>
    %cst_16 = arith.constant dense<0.000000e+00> : vector<8x128xf32>
    %17 = tpu.matmul %14, %15, %cst_16 {dimension_numbers = #tpu.dot_dimension_numbers<[1], [0], [0], [1], [0, 0, 1, 1], [], []>} : vector<8x128xf32>, vector<128x128xf32>, vector<8x128xf32> -> vector<8x128xf32>
    %18 = vector.broadcast %16 : vector<1x128xf32> to vector<8x128xf32>
    %19 = arith.addf %17, %18 : vector<8x128xf32>
    %cst_17 = arith.constant 0.000000e+00 : f32
    %20 = vector.broadcast %cst_17 : f32 to vector<8x128xf32>
    %21 = arith.maximumf %19, %20 : vector<8x128xf32>
    %c0_18 = arith.constant 0 : index
    %c0_19 = arith.constant 0 : index
    %22 = vector.load %arg8[%c0_18, %c0_19] : memref<128x128xf32, #tpu.memory_space<vmem>>, vector<128x128xf32>
    %c0_20 = arith.constant 0 : index
    %c0_21 = arith.constant 0 : index
    %23 = vector.load %arg9[%c0_20, %c0_21] : memref<1x128xf32, #tpu.memory_space<vmem>>, vector<1x128xf32>
    %cst_22 = arith.constant dense<0.000000e+00> : vector<8x128xf32>
    %24 = tpu.matmul %21, %22, %cst_22 {dimension_numbers = #tpu.dot_dimension_numbers<[1], [0], [0], [1], [0, 0, 1, 1], [], []>} : vector<8x128xf32>, vector<128x128xf32>, vector<8x128xf32> -> vector<8x128xf32>
    %25 = vector.broadcast %23 : vector<1x128xf32> to vector<8x128xf32>
    %26 = arith.addf %24, %25 : vector<8x128xf32>
    %c0_23 = arith.constant 0 : index
    %c0_24 = arith.constant 0 : index
    %27 = vector.load %arg10[%c0_23, %c0_24] : memref<8x128xf32, #tpu.memory_space<vmem>>, vector<8x128xf32>
    tpu.vector_store %arg10[%c0_23, %c0_24], %26 {strides = array<i32>} : memref<8x128xf32, #tpu.memory_space<vmem>>, vector<8x128xf32>,
    return
  }
  func.func @transform_0(%arg0: i32) -> (i32, i32) {
    %c0_i32 = arith.constant 0 : i32
    %c0_i32_0 = arith.constant 0 : i32
    return %arg0, %c0_i32 : i32, i32
  }
  func.func @transform_1(%arg0: i32) -> (i32, i32) {
    %c0_i32 = arith.constant 0 : i32
    %c0_i32_0 = arith.constant 0 : i32
    %c0_i32_1 = arith.constant 0 : i32
    return %c0_i32, %c0_i32_0 : i32, i32
  }
  func.func @transform_2(%arg0: i32) -> (i32, i32) {
    %c0_i32 = arith.constant 0 : i32
    %c0_i32_0 = arith.constant 0 : i32
    %c0_i32_1 = arith.constant 0 : i32
    return %c0_i32, %c0_i32_0 : i32, i32
  }
  func.func @transform_3(%arg0: i32) -> (i32, i32) {
    %c0_i32 = arith.constant 0 : i32
    %c0_i32_0 = arith.constant 0 : i32
    %c0_i32_1 = arith.constant 0 : i32
    return %c0_i32, %c0_i32_0 : i32, i32
  }
  func.func @transform_4(%arg0: i32) -> (i32, i32) {
    %c0_i32 = arith.constant 0 : i32
    %c0_i32_0 = arith.constant 0 : i32
    %c0_i32_1 = arith.constant 0 : i32
    return %c0_i32, %c0_i32_0 : i32, i32
  }
  func.func @transform_5(%arg0: i32) -> (i32, i32) {
    %c0_i32 = arith.constant 0 : i32
    %c0_i32_0 = arith.constant 0 : i32
    %c0_i32_1 = arith.constant 0 : i32
    return %c0_i32, %c0_i32_0 : i32, i32
  }
  func.func @transform_6(%arg0: i32) -> (i32, i32) {
    %c0_i32 = arith.constant 0 : i32
    %c0_i32_0 = arith.constant 0 : i32
    %c0_i32_1 = arith.constant 0 : i32
    return %c0_i32, %c0_i32_0 : i32, i32
  }
  func.func @transform_7(%arg0: i32) -> (i32, i32) {
    %c0_i32 = arith.constant 0 : i32
    %c0_i32_0 = arith.constant 0 : i32
    %c0_i32_1 = arith.constant 0 : i32
    return %c0_i32, %c0_i32_0 : i32, i32
  }
  func.func @transform_8(%arg0: i32) -> (i32, i32) {
    %c0_i32 = arith.constant 0 : i32
    %c0_i32_0 = arith.constant 0 : i32
    %c0_i32_1 = arith.constant 0 : i32
    return %c0_i32, %c0_i32_0 : i32, i32
  }
  func.func @transform_9(%arg0: i32) -> (i32, i32) {
    %c0_i32 = arith.constant 0 : i32
    %c0_i32_0 = arith.constant 0 : i32
    return %arg0, %c0_i32 : i32, i32
  }
}

module attributes {stable_mosaic.version = 11 : i64} {
  func.func @kernel(%arg0: i32, %arg1: memref<8x128xf32, #tpu.memory_space<vmem>>, %arg2: memref<128x128xf32, #tpu.memory_space<vmem>>, %arg3: memref<1x128xf32, #tpu.memory_space<vmem>>, %arg4: memref<128x128xf32, #tpu.memory_space<vmem>>, %arg5: memref<1x128xf32, #tpu.memory_space<vmem>>, %arg6: memref<128x128xf32, #tpu.memory_space<vmem>>, %arg7: memref<1x128xf32, #tpu.memory_space<vmem>>, %arg8: memref<128x128xf32, #tpu.memory_space<vmem>>, %arg9: memref<1x128xf32, #tpu.memory_space<vmem>>, %arg10: memref<8x128xf32, #tpu.memory_space<vmem>>) attributes {dimension_semantics = [#tpu.dimension_semantics<parallel>], iteration_bounds = array<i64: 1>, scalar_prefetch = 0 : i64, scratch_operands = 0 : i64, tpu.core_type = #tpu.core_type<tc>, window_params = [{transform_indices = @transform_0, window_bounds = array<i64: 8, 128>}, {pipeline_mode = #tpu.pipeline_mode<synchronous>, transform_indices = @transform_1, window_bounds = array<i64: 128, 128>}, {pipeline_mode = #tpu.pipeline_mode<synchronous>, transform_indices = @transform_2, window_bounds = array<i64: 1, 128>}, {pipeline_mode = #tpu.pipeline_mode<synchronous>, transform_indices = @transform_3, window_bounds = array<i64: 128, 128>}, {pipeline_mode = #tpu.pipeline_mode<synchronous>, transform_indices = @transform_4, window_bounds = array<i64: 1, 128>}, {pipeline_mode = #tpu.pipeline_mode<synchronous>, transform_indices = @transform_5, window_bounds = array<i64: 128, 128>}, {pipeline_mode = #tpu.pipeline_mode<synchronous>, transform_indices = @transform_6, window_bounds = array<i64: 1, 128>}, {pipeline_mode = #tpu.pipeline_mode<synchronous>, transform_indices = @transform_7, window_bounds = array<i64: 128, 128>}, {pipeline_mode = #tpu.pipeline_mode<synchronous>, transform_indices = @transform_8, window_bounds = array<i64: 1, 128>}, {transform_indices = @transform_9, window_bounds = array<i64: 8, 128>}]} {
    %c0 = arith.constant 0 : index
    %c0_0 = arith.constant 0 : index
    %0 = vector.load %arg1[%c0, %c0_0] : memref<8x128xf32, #tpu.memory_space<vmem>>, vector<8x128xf32>
    %c0_1 = arith.constant 0 : index
    %c0_2 = arith.constant 0 : index
    %1 = vector.load %arg2[%c0_1, %c0_2] : memref<128x128xf32, #tpu.memory_space<vmem>>, vector<128x128xf32>
    %c0_3 = arith.constant 0 : index
    %c0_4 = arith.constant 0 : index
    %2 = vector.load %arg3[%c0_3, %c0_4] : memref<1x128xf32, #tpu.memory_space<vmem>>, vector<1x128xf32>
    %cst = arith.constant dense<0.000000e+00> : vector<8x128xf32>
    %3 = tpu.matmul %0, %1, %cst {dimension_numbers = #tpu.dot_dimension_numbers<[1], [0], [0], [1], [0, 0, 1, 1], [], []>} : vector<8x128xf32>, vector<128x128xf32>, vector<8x128xf32> -> vector<8x128xf32>
    %4 = vector.broadcast %2 : vector<1x128xf32> to vector<8x128xf32>
    %5 = arith.addf %3, %4 : vector<8x128xf32>
    %cst_5 = arith.constant 0.000000e+00 : f32
    %6 = vector.broadcast %cst_5 : f32 to vector<8x128xf32>
    %7 = arith.maximumf %5, %6 : vector<8x128xf32>
    %c0_6 = arith.constant 0 : index
    %c0_7 = arith.constant 0 : index
    %8 = vector.load %arg4[%c0_6, %c0_7] : memref<128x128xf32, #tpu.memory_space<vmem>>, vector<128x128xf32>
    %c0_8 = arith.constant 0 : index
    %c0_9 = arith.constant 0 : index
    %9 = vector.load %arg5[%c0_8, %c0_9] : memref<1x128xf32, #tpu.memory_space<vmem>>, vector<1x128xf32>
    %cst_10 = arith.constant dense<0.000000e+00> : vector<8x128xf32>
    %10 = tpu.matmul %7, %8, %cst_10 {dimension_numbers = #tpu.dot_dimension_numbers<[1], [0], [0], [1], [0, 0, 1, 1], [], []>} : vector<8x128xf32>, vector<128x128xf32>, vector<8x128xf32> -> vector<8x128xf32>
    %11 = vector.broadcast %9 : vector<1x128xf32> to vector<8x128xf32>
    %12 = arith.addf %10, %11 : vector<8x128xf32>
    %cst_11 = arith.constant 0.000000e+00 : f32
    %13 = vector.broadcast %cst_11 : f32 to vector<8x128xf32>
    %14 = arith.maximumf %12, %13 : vector<8x128xf32>
    %c0_12 = arith.constant 0 : index
    %c0_13 = arith.constant 0 : index
    %15 = vector.load %arg6[%c0_12, %c0_13] : memref<128x128xf32, #tpu.memory_space<vmem>>, vector<128x128xf32>
    %c0_14 = arith.constant 0 : index
    %c0_15 = arith.constant 0 : index
    %16 = vector.load %arg7[%c0_14, %c0_15] : memref<1x128xf32, #tpu.memory_space<vmem>>, vector<1x128xf32>
    %cst_16 = arith.constant dense<0.000000e+00> : vector<8x128xf32>
    %17 = tpu.matmul %14, %15, %cst_16 {dimension_numbers = #tpu.dot_dimension_numbers<[1], [0], [0], [1], [0, 0, 1, 1], [], []>} : vector<8x128xf32>, vector<128x128xf32>, vector<8x128xf32> -> vector<8x128xf32>
    %18 = vector.broadcast %16 : vector<1x128xf32> to vector<8x128xf32>
    %19 = arith.addf %17, %18 : vector<8x128xf32>
    %cst_17 = arith.constant 0.000000e+00 : f32
    %20 = vector.broadcast %cst_17 : f32 to vector<8x128xf32>
    %21 = arith.maximumf %19, %20 : vector<8x128xf32>
    %c0_18 = arith.constant 0 : index
    %c0_19 = arith.constant 0 : index
    %22 = vector.load %arg8[%c0_18, %c0_19] : memref<128x128xf32, #tpu.memory_space<vmem>>, vector<128x128xf32>
    %c0_20 = arith.constant 0 : index
    %c0_21 = arith.constant 0 : index
    %23 = vector.load %arg9[%c0_20, %c0_21] : memref<1x128xf32, #tpu.memory_space<vmem>>, vector<1x128xf32>
    %cst_22 = arith.constant dense<0.000000e+00> : vector<8x128xf32>
    %24 = tpu.matmul %21, %22, %cst_22 {dimension_numbers = #tpu.dot_dimension_numbers<[1], [0], [0], [1], [0, 0, 1, 1], [], []>} : vector<8x128xf32>, vector<128x128xf32>, vector<8x128xf32> -> vector<8x128xf32>
    %25 = vector.broadcast %23 : vector<1x128xf32> to vector<8x128xf32>
    %26 = arith.addf %24, %25 : vector<8x128xf32>
    %c0_23 = arith.constant 0 : index
    %c0_24 = arith.constant 0 : index
    %27 = vector.load %arg10[%c0_23, %c0_24] : memref<8x128xf32, #tpu.memory_space<vmem>>, vector<8x128xf32>
    tpu.vector_store %arg10[%c0_23, %c0_24], %26 {strides = array<i32>} : memref<8x128xf32, #tpu.memory_space<vmem>>, vector<8x128xf32>,
    return
  }
  func.func @transform_0(%arg0: i32) -> (i32, i32) {
    %c0_i32 = arith.constant 0 : i32
    %c0_i32_0 = arith.constant 0 : i32
    return %arg0, %c0_i32 : i32, i32
  }
  func.func @transform_1(%arg0: i32) -> (i32, i32) {
    %c0_i32 = arith.constant 0 : i32
    %c0_i32_0 = arith.constant 0 : i32
    %c0_i32_1 = arith.constant 0 : i32
    return %c0_i32, %c0_i32_0 : i32, i32
  }
  func.func @transform_2(%arg0: i32) -> (i32, i32) {
    %c0_i32 = arith.constant 0 : i32
    %c0_i32_0 = arith.constant 0 : i32
    %c0_i32_1 = arith.constant 0 : i32
    return %c0_i32, %c0_i32_0 : i32, i32
  }
  func.func @transform_3(%arg0: i32) -> (i32, i32) {
    %c0_i32 = arith.constant 0 : i32
    %c0_i32_0 = arith.constant 0 : i32
    %c0_i32_1 = arith.constant 0 : i32
    return %c0_i32, %c0_i32_0 : i32, i32
  }
  func.func @transform_4(%arg0: i32) -> (i32, i32) {
    %c0_i32 = arith.constant 0 : i32
    %c0_i32_0 = arith.constant 0 : i32
    %c0_i32_1 = arith.constant 0 : i32
    return %c0_i32, %c0_i32_0 : i32, i32
  }
  func.func @transform_5(%arg0: i32) -> (i32, i32) {
    %c0_i32 = arith.constant 0 : i32
    %c0_i32_0 = arith.constant 0 : i32
    %c0_i32_1 = arith.constant 0 : i32
    return %c0_i32, %c0_i32_0 : i32, i32
  }
  func.func @transform_6(%arg0: i32) -> (i32, i32) {
    %c0_i32 = arith.constant 0 : i32
    %c0_i32_0 = arith.constant 0 : i32
    %c0_i32_1 = arith.constant 0 : i32
    return %c0_i32, %c0_i32_0 : i32, i32
  }
  func.func @transform_7(%arg0: i32) -> (i32, i32) {
    %c0_i32 = arith.constant 0 : i32
    %c0_i32_0 = arith.constant 0 : i32
    %c0_i32_1 = arith.constant 0 : i32
    return %c0_i32, %c0_i32_0 : i32, i32
  }
  func.func @transform_8(%arg0: i32) -> (i32, i32) {
    %c0_i32 = arith.constant 0 : i32
    %c0_i32_0 = arith.constant 0 : i32
    %c0_i32_1 = arith.constant 0 : i32
    return %c0_i32, %c0_i32_0 : i32, i32
  }
  func.func @transform_9(%arg0: i32) -> (i32, i32) {
    %c0_i32 = arith.constant 0 : i32
    %c0_i32_0 = arith.constant 0 : i32
    return %arg0, %c0_i32 : i32, i32
  }
}

</mosaic_0001>

<bundles_post_ra>
// kernel: dmlp_forward.1
= control target key start
LH: loop header
LB: loop body
LE: loop exit
PB: predicated region body
PF: predicated region fallthrough
CT: control target
= control target key end

     0   :  { %v760_v3 = vmov 0.0|0.0   ;;  %vm761_vm0 = vmmov 0   ;;  %v762_v6 = vmov 0.0   ;;  %s1073_s0 = inlined_call_operand.vmem [shape: f32[8,128], index: 0, kind: input, shape index: {}]   ;;  %s1074_s1 = inlined_call_operand.vmem [shape: f32[128,128], index: 1, kind: input, shape index: {}]   ;;  %s1075_s2 = inlined_call_operand.vmem [shape: f32[1,128], index: 2, kind: input, shape index: {}]   ;;  %s1076_s3 = inlined_call_operand.vmem [shape: f32[128,128], index: 3, kind: input, shape index: {}]   ;;  %s1077_s4 = inlined_call_operand.vmem [shape: f32[1,128], index: 4, kind: input, shape index: {}]   ;;  %s1078_s5 = inlined_call_operand.vmem [shape: f32[128,128], index: 5, kind: input, shape index: {}]   ;;  %s1079_s6 = inlined_call_operand.vmem [shape: f32[1,128], index: 6, kind: input, shape index: {}]   ;;  %s1080_s7 = inlined_call_operand.vmem [shape: f32[128,128], index: 7, kind: input, shape index: {}]   ;;  %s1081_s8 = inlined_call_operand.vmem [shape: f32[1,128], index: 8, kind: input, shape index: {}]   ;;  %s1082_s9 = inlined_call_operand.hbm [shape: f32[8,128], index: 9, kind: output, shape index: {}]  }
   0x1   :  { %v34_v0 = vld [vmem:[%s1074_s1] sm:$0xff]  ;;  %v35_v1 = vld [vmem:[%s1074_s1 + $0x8] sm:$0xff]  ;;  %v36_v2 = vld [vmem:[%s1074_s1 + $0x10] sm:$0xff]  ;;  %636 = vmatprep.subr.bf16.mxu0 %v760_v3  ;;  %528 = vmatprep.mubr.msk.f32.mxu0 %vm761_vm0, %v762_v6 }
   0x2   :  { %v637_v4 = vpack.c.bf16 %v35_v1, %v34_v0  ;;  %v37_v5 = vld [vmem:[%s1074_s1 + $0x18] sm:$0xff]  ;;  %660 = vmatprep.subr.bf16.mxu1 %v760_v3  ;;  %563 = vmatprep.mubr.msk.f32.mxu1 %vm761_vm0, %v762_v6  ;;  %v38_v8 = vld [vmem:[%s1074_s1 + $0x20] sm:$0xff]  ;;  %v39_v9 = vld [vmem:[%s1074_s1 + $0x28] sm:$0xff] }
   0x3   :  { %v640_v7 = vpack.c.bf16 %v37_v5, %v36_v2  ;;  %v128_v10 = vld [vmem:[%s1076_s3] sm:$0xff]  ;;  %v129_v11 = vld [vmem:[%s1076_s3 + $0x8] sm:$0xff]  ;;  %v130_v12 = vld [vmem:[%s1076_s3 + $0x10] sm:$0xff]  ;;  %v643_v14 = vpack.c.bf16 %v39_v9, %v38_v8 }
   0x4   :  { %638 = vmatpush3.bf16.msra.mxu0 %v637_v4  ;;  %v131_v13 = vld [vmem:[%s1076_s3 + $0x18] sm:$0xff]  ;;  %v661_v15 = vpack.c.bf16 %v129_v11, %v128_v10  ;;  %v40_v16 = vld [vmem:[%s1074_s1 + $0x30] sm:$0xff]  ;;  %v132_v19 = vld [vmem:[%s1076_s3 + $0x20] sm:$0xff] }
   0x5   :  { %639 = vmatprep.subr.bf16.mxu0 %v760_v3  ;;  %v41_v17 = vld [vmem:[%s1074_s1 + $0x38] sm:$0xff]  ;;  %v664_v18 = vpack.c.bf16 %v131_v13, %v130_v12  ;;  %v133_v20 = vld [vmem:[%s1076_s3 + $0x28] sm:$0xff] }
   0x6   :  { %662 = vmatpush3.bf16.msra.mxu1 %v661_v15 }
   0x7   :  { %663 = vmatprep.subr.bf16.mxu1 %v760_v3 }
   0x8   :  { %641 = vmatpush3.bf16.msra.mxu0 %v640_v7 }
   0x9   :  { %642 = vmatprep.subr.bf16.mxu0 %v760_v3 }
   0xa   :  { %14 = vsyncpa [#allocation3], 0  ;;  %v646_v21 = vpack.c.bf16 %v41_v17, %v40_v16  ;;  %v42_v22 = vld [vmem:[%s1074_s1 + $0x40] sm:$0xff]  ;;  %v43_v23 = vld [vmem:[%s1074_s1 + $0x48] sm:$0xff]  ;;  %665 = vmatpush3.bf16.msra.mxu1 %v664_v18  ;;  %v667_v24 = vpack.c.bf16 %v133_v20, %v132_v19  ;;  %s763_s27 = smov [#allocation2]  }
   0xb   :  { %666 = vmatprep.subr.bf16.mxu1 %v760_v3  ;;  %v134_v25 = vld [vmem:[%s1076_s3 + $0x30] sm:$0xff]  ;;  %v135_v26 = vld [vmem:[%s1076_s3 + $0x38] sm:$0xff]  ;;  %v649_v27 = vpack.c.bf16 %v43_v23, %v42_v22  ;;  %v136_v31 = vld [vmem:[%s1076_s3 + $0x40] sm:$0xff]  ;;  %s416_s28 = sshll.u32 %s763_s27, 4  ;;  %s417_s28 = int_to_ptr.vmem [resolvable:$true] %s416_s28 }
   0xc   :  { %644 = vmatpush3.bf16.msra.mxu0 %v643_v14  ;;  %v44_v28 = vld [vmem:[%s1074_s1 + $0x50] sm:$0xff]  ;;  %v45_v29 = vld [vmem:[%s1074_s1 + $0x58] sm:$0xff]  ;;  %v670_v30 = vpack.c.bf16 %v135_v26, %v134_v25  ;;  %v137_v32 = vld [vmem:[%s1076_s3 + $0x48] sm:$0xff]  ;;  %p741_p1 = scmp.lt.s32.totalorder %s417_s28, %s417_s28 }
   0xd   :  { %645 = vmatprep.subr.bf16.mxu0 %v760_v3  ;;  %v652_v33 = vpack.c.bf16 %v45_v29, %v44_v28  ;;  %v46_v34 = vld [vmem:[%s1074_s1 + $0x60] sm:$0xff]  ;;  %v47_v35 = vld [vmem:[%s1074_s1 + $0x68] sm:$0xff]  ;;  %v673_v36 = vpack.c.bf16 %v137_v32, %v136_v31  ;;  %v138_v37 = vld [vmem:[%s1076_s3 + $0x50] sm:$0xff] }
   0xe   :  { %668 = vmatpush3.bf16.msra.mxu1 %v667_v24  ;;  %v139_v38 = vld [vmem:[%s1076_s3 + $0x58] sm:$0xff]  ;;  %v655_v39 = vpack.c.bf16 %v47_v35, %v46_v34  ;;  %v48_v40 = vld [vmem:[%s1074_s1 + $0x70] sm:$0xff]  ;;  %v140_v43 = vld [vmem:[%s1076_s3 + $0x60] sm:$0xff] }
   0xf   :  { %669 = vmatprep.subr.bf16.mxu1 %v760_v3  ;;  %v49_v41 = vld [vmem:[%s1074_s1 + $0x78] sm:$0xff]  ;;  %v676_v42 = vpack.c.bf16 %v139_v38, %v138_v37  ;;  %v141_v44 = vld [vmem:[%s1076_s3 + $0x68] sm:$0xff]  ;;  %v33_v47 = vld [vmem:[%s1073_s0] sm:$0xff] }
  0x10   :  { %647 = vmatpush3.bf16.msra.mxu0 %v646_v21  ;;  %v658_v45 = vpack.c.bf16 %v49_v41, %v48_v40  ;;  %v679_v46 = vpack.c.bf16 %v141_v44, %v140_v43  ;;  %v142_v48 = vld [vmem:[%s1076_s3 + $0x70] sm:$0xff]  ;;  %v143_v49 = vld [vmem:[%s1076_s3 + $0x78] sm:$0xff]  ;;  %v222_v51 = vld [vmem:[%s1078_s5] sm:$0xff] }
  0x11   :  { %648 = vmatprep.subr.bf16.mxu0 %v760_v3  ;;  %v682_v50 = vpack.c.bf16 %v143_v49, %v142_v48  ;;  %v223_v52 = vld [vmem:[%s1078_s5 + $0x8] sm:$0xff]  ;;  %v224_v53 = vld [vmem:[%s1078_s5 + $0x10] sm:$0xff]  ;;  %v225_v55 = vld [vmem:[%s1078_s5 + $0x18] sm:$0xff] }
  0x12   :  { %671 = vmatpush3.bf16.msra.mxu1 %v670_v30  ;;  %v685_v54 = vpack.c.bf16 %v223_v52, %v222_v51  ;;  %v688_v56 = vpack.c.bf16 %v225_v55, %v224_v53  ;;  %v226_v57 = vld [vmem:[%s1078_s5 + $0x20] sm:$0xff]  ;;  %v227_v58 = vld [vmem:[%s1078_s5 + $0x28] sm:$0xff]  ;;  %v228_v60 = vld [vmem:[%s1078_s5 + $0x30] sm:$0xff] }
  0x13   :  { %672 = vmatprep.subr.bf16.mxu1 %v760_v3  ;;  %v691_v59 = vpack.c.bf16 %v227_v58, %v226_v57  ;;  %v229_v61 = vld [vmem:[%s1078_s5 + $0x38] sm:$0xff]  ;;  %v230_v63 = vld [vmem:[%s1078_s5 + $0x40] sm:$0xff]  ;;  %v231_v0 = vld [vmem:[%s1078_s5 + $0x48] sm:$0xff] }
  0x14   :  { %650 = vmatpush3.bf16.msra.mxu0 %v649_v27  ;;  %v694_v62 = vpack.c.bf16 %v229_v61, %v228_v60  ;;  %v697_v1 = vpack.c.bf16 %v231_v0, %v230_v63  ;;  %v232_v2 = vld [vmem:[%s1078_s5 + $0x50] sm:$0xff]  ;;  %v233_v4 = vld [vmem:[%s1078_s5 + $0x58] sm:$0xff]  ;;  %v234_v7 = vld [vmem:[%s1078_s5 + $0x60] sm:$0xff] }
  0x15   :  { %651 = vmatprep.subr.bf16.mxu0 %v760_v3  ;;  %v700_v5 = vpack.c.bf16 %v233_v4, %v232_v2  ;;  %v235_v8 = vld [vmem:[%s1078_s5 + $0x68] sm:$0xff]  ;;  %v424_v10 = vld [vmem:[%s1075_s2] ss:$0 sm:$0xff]  ;;  %v236_v15 = vld [vmem:[%s1078_s5 + $0x70] sm:$0xff] }
  0x16   :  { %674 = vmatpush3.bf16.msra.mxu1 %v673_v36  ;;  %v703_v9 = vpack.c.bf16 %v235_v8, %v234_v7  ;;  %v237_v16 = vld [vmem:[%s1078_s5 + $0x78] sm:$0xff]  ;;  %v316_v18 = vld [vmem:[%s1080_s7] sm:$0xff]  ;;  %v317_v19 = vld [vmem:[%s1080_s7 + $0x8] sm:$0xff] }
  0x17   :  { %675 = vmatprep.subr.bf16.mxu1 %v760_v3  ;;  %v706_v17 = vpack.c.bf16 %v237_v16, %v236_v15  ;;  %v709_v20 = vpack.c.bf16 %v317_v19, %v316_v18  ;;  %v319_v21 = vld [vmem:[%s1080_s7 + $0x18] sm:$0xff]  ;;  %v320_v23 = vld [vmem:[%s1080_s7 + $0x20] sm:$0xff]  ;;  %v321_v24 = vld [vmem:[%s1080_s7 + $0x28] sm:$0xff] }
  0x18   :  { %653 = vmatpush3.bf16.msra.mxu0 %v652_v33  ;;  %v715_v25 = vpack.c.bf16 %v321_v24, %v320_v23  ;;  %v322_v26 = vld [vmem:[%s1080_s7 + $0x30] sm:$0xff]  ;;  %v323_v27 = vld [vmem:[%s1080_s7 + $0x38] sm:$0xff]  ;;  %v324_v29 = vld [vmem:[%s1080_s7 + $0x40] sm:$0xff] }
  0x19   :  { %654 = vmatprep.subr.bf16.mxu0 %v760_v3  ;;  %v718_v28 = vpack.c.bf16 %v323_v27, %v322_v26  ;;  %v325_v30 = vld [vmem:[%s1080_s7 + $0x48] sm:$0xff]  ;;  %v326_v32 = vld [vmem:[%s1080_s7 + $0x50] sm:$0xff]  ;;  %v327_v33 = vld [vmem:[%s1080_s7 + $0x58] sm:$0xff] }
  0x1a   :  { %677 = vmatpush3.bf16.msra.mxu1 %v676_v42  ;;  %v721_v31 = vpack.c.bf16 %v325_v30, %v324_v29  ;;  %v724_v34 = vpack.c.bf16 %v327_v33, %v326_v32  ;;  %v328_v35 = vld [vmem:[%s1080_s7 + $0x60] sm:$0xff]  ;;  %v329_v36 = vld [vmem:[%s1080_s7 + $0x68] sm:$0xff]  ;;  %v330_v43 = vld [vmem:[%s1080_s7 + $0x70] sm:$0xff] }
  0x1b   :  { %678 = vmatprep.subr.bf16.mxu1 %v760_v3  ;;  %v727_v37 = vpack.c.bf16 %v329_v36, %v328_v35  ;;  %v425_v38 = vld [vmem:[%s1077_s4] ss:$0 sm:$0xff]  ;;  %v331_v44 = vld [vmem:[%s1080_s7 + $0x78] sm:$0xff] }
  0x1c   :  { %656 = vmatpush3.bf16.msra.mxu0 %v655_v39 }
  0x1d   :  { %657 = vmatprep.subr.bf16.mxu0 %v760_v3 }
  0x1e   :  { %680 = vmatpush3.bf16.msra.mxu1 %v679_v46 }
  0x1f   :  { %681 = vmatprep.subr.bf16.mxu1 %v760_v3 }
  0x20   :  { %659 = vmatpush3.bf16.msra.mxu0 %v658_v45  ;;  %v730_v45 = vpack.c.bf16 %v331_v44, %v330_v43 }
  0x21   :  { %684 = vmatprep.subr.bf16.mxu0 %v760_v3 }
  0x22   :  { %683 = vmatpush3.bf16.msra.mxu1 %v682_v50  ;;  %v427_v50 = vld [vmem:[%s1081_s8] ss:$0 sm:$0xff] }
  0x23   :  { %529 = vmatmul.mubr.f32.vlgmr.msra.gmra.mrb[0].mxu0 %v33_v47  ;;  %708 = vmatprep.subr.bf16.mxu1 %v760_v3 }
  0x24   :  { %598 = vmatprep.mubr.msk.f32.mxu0 %vm761_vm0, %v762_v6  ;;  %686 = vmatpush3.bf16.msra.mxu0 %v685_v54 }
  0x25   :  { %687 = vmatprep.subr.bf16.mxu0 %v760_v3 }
  0x28   :  { %689 = vmatpush3.bf16.msra.mxu0 %v688_v56 }
  0x29   :  { %690 = vmatprep.subr.bf16.mxu0 %v760_v3 }
  0x2c   :  { %692 = vmatpush3.bf16.msra.mxu0 %v691_v59 }
  0x2d   :  { %693 = vmatprep.subr.bf16.mxu0 %v760_v3 }
  0x30   :  { %695 = vmatpush3.bf16.msra.mxu0 %v694_v62 }
  0x31   :  { %696 = vmatprep.subr.bf16.mxu0 %v760_v3 }
  0x34   :  { %698 = vmatpush3.bf16.msra.mxu0 %v697_v1 }
  0x35   :  { %699 = vmatprep.subr.bf16.mxu0 %v760_v3 }
  0x38   :  { %701 = vmatpush3.bf16.msra.mxu0 %v700_v5 }
  0x39   :  { %702 = vmatprep.subr.bf16.mxu0 %v760_v3 }
  0x3c   :  { %704 = vmatpush3.bf16.msra.mxu0 %v703_v9 }
  0x3d   :  { %705 = vmatprep.subr.bf16.mxu0 %v760_v3 }
  0x40   :  { %707 = vmatpush3.bf16.msra.mxu0 %v706_v17 }
  0xf6   :  { %v123_v11 = vpop.f32.mrb[0].mxu0 }
  0xf7   :  { %v124_v12 = vadd.f32 %v424_v10, %v123_v11  ;;  %v530_v13 = vpop.f32.mrb[1].mxu0 }
  0xf9   :  { %v127_v14 = vmax.f32 %v124_v12, 0.0 }
  0xfb   :  { %564 = vmatmul.mubr.f32.vlgmr.msra.gmra.mrb[0].mxu1 %v127_v14 }
  0xfc   :  { %633 = vmatprep.mubr.msk.f32.mxu1 %vm761_vm0, %v762_v6  ;;  %v318_v6 = vld [vmem:[%s1080_s7 + $0x10] sm:$0xff]  ;;  %710 = vmatpush3.bf16.msra.mxu1 %v709_v20  ;;  %s736_s7 = scalar_lea.vmem %s417_s28, 128 }
  0xfd   :  { %v712_v22 = vpack.c.bf16 %v319_v21, %v318_v6  ;;  %711 = vmatprep.subr.bf16.mxu1 %v760_v3  ;;  %p737_p0 = scmp.ne.s32.totalorder %s417_s28, %s736_s7  ;;  %p742_p2 = scmp.lt.s32.totalorder %s736_s7, %s736_s7 }
  0xff   :  { %p743_p3 = por %p742_p2, %p741_p1 }
 0x100   :  { %713 = vmatpush3.bf16.msra.mxu1 %v712_v22 }
 0x101   :  { %714 = vmatprep.subr.bf16.mxu1 %v760_v3  ;;  %p744_p4 = pnand %p743_p3, %p737_p0 }
 0x104   :  { %716 = vmatpush3.bf16.msra.mxu1 %v715_v25 }
 0x105   :  { %717 = vmatprep.subr.bf16.mxu1 %v760_v3 }
 0x108   :  { %719 = vmatpush3.bf16.msra.mxu1 %v718_v28 }
 0x109   :  { %720 = vmatprep.subr.bf16.mxu1 %v760_v3 }
 0x10c   :  { %722 = vmatpush3.bf16.msra.mxu1 %v721_v31 }
 0x10d   :  { %723 = vmatprep.subr.bf16.mxu1 %v760_v3 }
 0x110   :  { %725 = vmatpush3.bf16.msra.mxu1 %v724_v34 }
 0x111   :  { %726 = vmatprep.subr.bf16.mxu1 %v760_v3 }
 0x114   :  { %728 = vmatpush3.bf16.msra.mxu1 %v727_v37 }
 0x115   :  { %729 = vmatprep.subr.bf16.mxu1 %v760_v3  ;;  %v426_v3 = vld [vmem:[%s1079_s6] ss:$0 sm:$0xff] }
 0x118   :  { %731 = vmatpush3.bf16.msra.mxu1 %v730_v45 }
 0x1ce   :  { %v217_v39 = vpop.f32.mrb[0].mxu1 }
 0x1cf   :  { %v218_v40 = vadd.f32 %v425_v38, %v217_v39  ;;  %v565_v41 = vpop.f32.mrb[1].mxu1 }
 0x1d1   :  { %v221_v42 = vmax.f32 %v218_v40, 0.0 }
 0x1d3   :  { %599 = vmatmul.mubr.f32.vlgmr.msra.gmra.mrb[2].mxu0 %v221_v42 }
 0x2a6   :  { %v311_v46 = vpop.f32.mrb[2].mxu0 }
 0x2a7   :  { %v312_v47 = vadd.f32 %v426_v3, %v311_v46  ;;  %v600_v48 = vpop.f32.mrb[3].mxu0 }
 0x2a9   :  { %v315_v49 = vmax.f32 %v312_v47, 0.0 }
 0x2ab   :  { %634 = vmatmul.mubr.f32.vlgmr.msra.gmra.mrb[2].mxu1 %v315_v49 }
 0x37e   :  { %v405_v51 = vpop.f32.mrb[2].mxu1 }
 0x37f   :  { %v406_v52 = vadd.f32 %v427_v50, %v405_v51  ;;  %v635_v53 = vpop.f32.mrb[3].mxu1 }
 0x381   :  { %409 = vst [vmem:[#allocation2] sm:$0xff] %v406_v52 }
 0x382   :  { %747 = shalt.err (!%p744_p4)
}
 0x383   :  { %s748_s30 = scalar_lea.hbm %s1082_s9, 128 }
 0x384   :  { %p749_p5 = scmp.ne.s32.totalorder %s1082_s9, %s748_s30  ;;  %p752_p6 = scmp.lt.u32.totalorder %s748_s30, %s1082_s9 }
 0x386   :  { %p754_p7 = pnand %p752_p6, %p749_p5 }
 0x388   :  { %757 = shalt.err (!%p754_p7)
}
 0x389   :  { %419 = dma.vmem_to_hbm [thread:$0]  %s417_s28, 128, %s1082_s9, [#allocation3]  }
 0x38a   :  { %758 = dma.done.wait [#allocation3], 128  }
 0x38b   :  { %759 = vsyncadd [#allocation3], 4294967168 }
 0x38c   :  { %423 = vsyncpa [#allocation3], 1 }

// kernel: dmlp_forward.1
= control target key start
LH: loop header
LB: loop body
LE: loop exit
PB: predicated region body
PF: predicated region fallthrough
CT: control target
= control target key end

     0   :  { %v760_v3 = vmov 0.0|0.0   ;;  %vm761_vm0 = vmmov 0   ;;  %v762_v6 = vmov 0.0   ;;  %s1073_s0 = inlined_call_operand.vmem [shape: f32[8,128], index: 0, kind: input, shape index: {}]   ;;  %s1074_s1 = inlined_call_operand.vmem [shape: f32[128,128], index: 1, kind: input, shape index: {}]   ;;  %s1075_s2 = inlined_call_operand.vmem [shape: f32[1,128], index: 2, kind: input, shape index: {}]   ;;  %s1076_s3 = inlined_call_operand.vmem [shape: f32[128,128], index: 3, kind: input, shape index: {}]   ;;  %s1077_s4 = inlined_call_operand.vmem [shape: f32[1,128], index: 4, kind: input, shape index: {}]   ;;  %s1078_s5 = inlined_call_operand.vmem [shape: f32[128,128], index: 5, kind: input, shape index: {}]   ;;  %s1079_s6 = inlined_call_operand.vmem [shape: f32[1,128], index: 6, kind: input, shape index: {}]   ;;  %s1080_s7 = inlined_call_operand.vmem [shape: f32[128,128], index: 7, kind: input, shape index: {}]   ;;  %s1081_s8 = inlined_call_operand.vmem [shape: f32[1,128], index: 8, kind: input, shape index: {}]   ;;  %s1082_s9 = inlined_call_operand.hbm [shape: f32[8,128], index: 9, kind: output, shape index: {}]  }
   0x1   :  { %v34_v0 = vld [vmem:[%s1074_s1] sm:$0xff]  ;;  %v35_v1 = vld [vmem:[%s1074_s1 + $0x8] sm:$0xff]  ;;  %v36_v2 = vld [vmem:[%s1074_s1 + $0x10] sm:$0xff]  ;;  %636 = vmatprep.subr.bf16.mxu0 %v760_v3  ;;  %528 = vmatprep.mubr.msk.f32.mxu0 %vm761_vm0, %v762_v6 }
   0x2   :  { %v637_v4 = vpack.c.bf16 %v35_v1, %v34_v0  ;;  %v37_v5 = vld [vmem:[%s1074_s1 + $0x18] sm:$0xff]  ;;  %660 = vmatprep.subr.bf16.mxu1 %v760_v3  ;;  %563 = vmatprep.mubr.msk.f32.mxu1 %vm761_vm0, %v762_v6  ;;  %v38_v8 = vld [vmem:[%s1074_s1 + $0x20] sm:$0xff]  ;;  %v39_v9 = vld [vmem:[%s1074_s1 + $0x28] sm:$0xff] }
   0x3   :  { %v640_v7 = vpack.c.bf16 %v37_v5, %v36_v2  ;;  %v128_v10 = vld [vmem:[%s1076_s3] sm:$0xff]  ;;  %v129_v11 = vld [vmem:[%s1076_s3 + $0x8] sm:$0xff]  ;;  %v130_v12 = vld [vmem:[%s1076_s3 + $0x10] sm:$0xff]  ;;  %v643_v14 = vpack.c.bf16 %v39_v9, %v38_v8 }
   0x4   :  { %638 = vmatpush3.bf16.msra.mxu0 %v637_v4  ;;  %v131_v13 = vld [vmem:[%s1076_s3 + $0x18] sm:$0xff]  ;;  %v661_v15 = vpack.c.bf16 %v129_v11, %v128_v10  ;;  %v40_v16 = vld [vmem:[%s1074_s1 + $0x30] sm:$0xff]  ;;  %v132_v19 = vld [vmem:[%s1076_s3 + $0x20] sm:$0xff] }
   0x5   :  { %639 = vmatprep.subr.bf16.mxu0 %v760_v3  ;;  %v41_v17 = vld [vmem:[%s1074_s1 + $0x38] sm:$0xff]  ;;  %v664_v18 = vpack.c.bf16 %v131_v13, %v130_v12  ;;  %v133_v20 = vld [vmem:[%s1076_s3 + $0x28] sm:$0xff] }
   0x6   :  { %662 = vmatpush3.bf16.msra.mxu1 %v661_v15 }
   0x7   :  { %663 = vmatprep.subr.bf16.mxu1 %v760_v3 }
   0x8   :  { %641 = vmatpush3.bf16.msra.mxu0 %v640_v7 }
   0x9   :  { %642 = vmatprep.subr.bf16.mxu0 %v760_v3 }
   0xa   :  { %14 = vsyncpa [#allocation3], 0  ;;  %v646_v21 = vpack.c.bf16 %v41_v17, %v40_v16  ;;  %v42_v22 = vld [vmem:[%s1074_s1 + $0x40] sm:$0xff]  ;;  %v43_v23 = vld [vmem:[%s1074_s1 + $0x48] sm:$0xff]  ;;  %665 = vmatpush3.bf16.msra.mxu1 %v664_v18  ;;  %v667_v24 = vpack.c.bf16 %v133_v20, %v132_v19  ;;  %s763_s27 = smov [#allocation2]  }
   0xb   :  { %666 = vmatprep.subr.bf16.mxu1 %v760_v3  ;;  %v134_v25 = vld [vmem:[%s1076_s3 + $0x30] sm:$0xff]  ;;  %v135_v26 = vld [vmem:[%s1076_s3 + $0x38] sm:$0xff]  ;;  %v649_v27 = vpack.c.bf16 %v43_v23, %v42_v22  ;;  %v136_v31 = vld [vmem:[%s1076_s3 + $0x40] sm:$0xff]  ;;  %s416_s28 = sshll.u32 %s763_s27, 4  ;;  %s417_s28 = int_to_ptr.vmem [resolvable:$true] %s416_s28 }
   0xc   :  { %644 = vmatpush3.bf16.msra.mxu0 %v643_v14  ;;  %v44_v28 = vld [vmem:[%s1074_s1 + $0x50] sm:$0xff]  ;;  %v45_v29 = vld [vmem:[%s1074_s1 + $0x58] sm:$0xff]  ;;  %v670_v30 = vpack.c.bf16 %v135_v26, %v134_v25  ;;  %v137_v32 = vld [vmem:[%s1076_s3 + $0x48] sm:$0xff]  ;;  %p741_p1 = scmp.lt.s32.totalorder %s417_s28, %s417_s28 }
   0xd   :  { %645 = vmatprep.subr.bf16.mxu0 %v760_v3  ;;  %v652_v33 = vpack.c.bf16 %v45_v29, %v44_v28  ;;  %v46_v34 = vld [vmem:[%s1074_s1 + $0x60] sm:$0xff]  ;;  %v47_v35 = vld [vmem:[%s1074_s1 + $0x68] sm:$0xff]  ;;  %v673_v36 = vpack.c.bf16 %v137_v32, %v136_v31  ;;  %v138_v37 = vld [vmem:[%s1076_s3 + $0x50] sm:$0xff] }
   0xe   :  { %668 = vmatpush3.bf16.msra.mxu1 %v667_v24  ;;  %v139_v38 = vld [vmem:[%s1076_s3 + $0x58] sm:$0xff]  ;;  %v655_v39 = vpack.c.bf16 %v47_v35, %v46_v34  ;;  %v48_v40 = vld [vmem:[%s1074_s1 + $0x70] sm:$0xff]  ;;  %v140_v43 = vld [vmem:[%s1076_s3 + $0x60] sm:$0xff] }
   0xf   :  { %669 = vmatprep.subr.bf16.mxu1 %v760_v3  ;;  %v49_v41 = vld [vmem:[%s1074_s1 + $0x78] sm:$0xff]  ;;  %v676_v42 = vpack.c.bf16 %v139_v38, %v138_v37  ;;  %v141_v44 = vld [vmem:[%s1076_s3 + $0x68] sm:$0xff]  ;;  %v33_v47 = vld [vmem:[%s1073_s0] sm:$0xff] }
  0x10   :  { %647 = vmatpush3.bf16.msra.mxu0 %v646_v21  ;;  %v658_v45 = vpack.c.bf16 %v49_v41, %v48_v40  ;;  %v679_v46 = vpack.c.bf16 %v141_v44, %v140_v43  ;;  %v142_v48 = vld [vmem:[%s1076_s3 + $0x70] sm:$0xff]  ;;  %v143_v49 = vld [vmem:[%s1076_s3 + $0x78] sm:$0xff]  ;;  %v222_v51 = vld [vmem:[%s1078_s5] sm:$0xff] }
  0x11   :  { %648 = vmatprep.subr.bf16.mxu0 %v760_v3  ;;  %v682_v50 = vpack.c.bf16 %v143_v49, %v142_v48  ;;  %v223_v52 = vld [vmem:[%s1078_s5 + $0x8] sm:$0xff]  ;;  %v224_v53 = vld [vmem:[%s1078_s5 + $0x10] sm:$0xff]  ;;  %v225_v55 = vld [vmem:[%s1078_s5 + $0x18] sm:$0xff] }
  0x12   :  { %671 = vmatpush3.bf16.msra.mxu1 %v670_v30  ;;  %v685_v54 = vpack.c.bf16 %v223_v52, %v222_v51  ;;  %v688_v56 = vpack.c.bf16 %v225_v55, %v224_v53  ;;  %v226_v57 = vld [vmem:[%s1078_s5 + $0x20] sm:$0xff]  ;;  %v227_v58 = vld [vmem:[%s1078_s5 + $0x28] sm:$0xff]  ;;  %v228_v60 = vld [vmem:[%s1078_s5 + $0x30] sm:$0xff] }
  0x13   :  { %672 = vmatprep.subr.bf16.mxu1 %v760_v3  ;;  %v691_v59 = vpack.c.bf16 %v227_v58, %v226_v57  ;;  %v229_v61 = vld [vmem:[%s1078_s5 + $0x38] sm:$0xff]  ;;  %v230_v63 = vld [vmem:[%s1078_s5 + $0x40] sm:$0xff]  ;;  %v231_v0 = vld [vmem:[%s1078_s5 + $0x48] sm:$0xff] }
  0x14   :  { %650 = vmatpush3.bf16.msra.mxu0 %v649_v27  ;;  %v694_v62 = vpack.c.bf16 %v229_v61, %v228_v60  ;;  %v697_v1 = vpack.c.bf16 %v231_v0, %v230_v63  ;;  %v232_v2 = vld [vmem:[%s1078_s5 + $0x50] sm:$0xff]  ;;  %v233_v4 = vld [vmem:[%s1078_s5 + $0x58] sm:$0xff]  ;;  %v234_v7 = vld [vmem:[%s1078_s5 + $0x60] sm:$0xff] }
  0x15   :  { %651 = vmatprep.subr.bf16.mxu0 %v760_v3  ;;  %v700_v5 = vpack.c.bf16 %v233_v4, %v232_v2  ;;  %v235_v8 = vld [vmem:[%s1078_s5 + $0x68] sm:$0xff]  ;;  %v424_v10 = vld [vmem:[%s1075_s2] ss:$0 sm:$0xff]  ;;  %v236_v15 = vld [vmem:[%s1078_s5 + $0x70] sm:$0xff] }
  0x16   :  { %674 = vmatpush3.bf16.msra.mxu1 %v673_v36  ;;  %v703_v9 = vpack.c.bf16 %v235_v8, %v234_v7  ;;  %v237_v16 = vld [vmem:[%s1078_s5 + $0x78] sm:$0xff]  ;;  %v316_v18 = vld [vmem:[%s1080_s7] sm:$0xff]  ;;  %v317_v19 = vld [vmem:[%s1080_s7 + $0x8] sm:$0xff] }
  0x17   :  { %675 = vmatprep.subr.bf16.mxu1 %v760_v3  ;;  %v706_v17 = vpack.c.bf16 %v237_v16, %v236_v15  ;;  %v709_v20 = vpack.c.bf16 %v317_v19, %v316_v18  ;;  %v319_v21 = vld [vmem:[%s1080_s7 + $0x18] sm:$0xff]  ;;  %v320_v23 = vld [vmem:[%s1080_s7 + $0x20] sm:$0xff]  ;;  %v321_v24 = vld [vmem:[%s1080_s7 + $0x28] sm:$0xff] }
  0x18   :  { %653 = vmatpush3.bf16.msra.mxu0 %v652_v33  ;;  %v715_v25 = vpack.c.bf16 %v321_v24, %v320_v23  ;;  %v322_v26 = vld [vmem:[%s1080_s7 + $0x30] sm:$0xff]  ;;  %v323_v27 = vld [vmem:[%s1080_s7 + $0x38] sm:$0xff]  ;;  %v324_v29 = vld [vmem:[%s1080_s7 + $0x40] sm:$0xff] }
  0x19   :  { %654 = vmatprep.subr.bf16.mxu0 %v760_v3  ;;  %v718_v28 = vpack.c.bf16 %v323_v27, %v322_v26  ;;  %v325_v30 = vld [vmem:[%s1080_s7 + $0x48] sm:$0xff]  ;;  %v326_v32 = vld [vmem:[%s1080_s7 + $0x50] sm:$0xff]  ;;  %v327_v33 = vld [vmem:[%s1080_s7 + $0x58] sm:$0xff] }
  0x1a   :  { %677 = vmatpush3.bf16.msra.mxu1 %v676_v42  ;;  %v721_v31 = vpack.c.bf16 %v325_v30, %v324_v29  ;;  %v724_v34 = vpack.c.bf16 %v327_v33, %v326_v32  ;;  %v328_v35 = vld [vmem:[%s1080_s7 + $0x60] sm:$0xff]  ;;  %v329_v36 = vld [vmem:[%s1080_s7 + $0x68] sm:$0xff]  ;;  %v330_v43 = vld [vmem:[%s1080_s7 + $0x70] sm:$0xff] }
  0x1b   :  { %678 = vmatprep.subr.bf16.mxu1 %v760_v3  ;;  %v727_v37 = vpack.c.bf16 %v329_v36, %v328_v35  ;;  %v425_v38 = vld [vmem:[%s1077_s4] ss:$0 sm:$0xff]  ;;  %v331_v44 = vld [vmem:[%s1080_s7 + $0x78] sm:$0xff] }
  0x1c   :  { %656 = vmatpush3.bf16.msra.mxu0 %v655_v39 }
  0x1d   :  { %657 = vmatprep.subr.bf16.mxu0 %v760_v3 }
  0x1e   :  { %680 = vmatpush3.bf16.msra.mxu1 %v679_v46 }
  0x1f   :  { %681 = vmatprep.subr.bf16.mxu1 %v760_v3 }
  0x20   :  { %659 = vmatpush3.bf16.msra.mxu0 %v658_v45  ;;  %v730_v45 = vpack.c.bf16 %v331_v44, %v330_v43 }
  0x21   :  { %684 = vmatprep.subr.bf16.mxu0 %v760_v3 }
  0x22   :  { %683 = vmatpush3.bf16.msra.mxu1 %v682_v50  ;;  %v427_v50 = vld [vmem:[%s1081_s8] ss:$0 sm:$0xff] }
  0x23   :  { %529 = vmatmul.mubr.f32.vlgmr.msra.gmra.mrb[0].mxu0 %v33_v47  ;;  %708 = vmatprep.subr.bf16.mxu1 %v760_v3 }
  0x24   :  { %598 = vmatprep.mubr.msk.f32.mxu0 %vm761_vm0, %v762_v6  ;;  %686 = vmatpush3.bf16.msra.mxu0 %v685_v54 }
  0x25   :  { %687 = vmatprep.subr.bf16.mxu0 %v760_v3 }
  0x28   :  { %689 = vmatpush3.bf16.msra.mxu0 %v688_v56 }
  0x29   :  { %690 = vmatprep.subr.bf16.mxu0 %v760_v3 }
  0x2c   :  { %692 = vmatpush3.bf16.msra.mxu0 %v691_v59 }
  0x2d   :  { %693 = vmatprep.subr.bf16.mxu0 %v760_v3 }
  0x30   :  { %695 = vmatpush3.bf16.msra.mxu0 %v694_v62 }
  0x31   :  { %696 = vmatprep.subr.bf16.mxu0 %v760_v3 }
  0x34   :  { %698 = vmatpush3.bf16.msra.mxu0 %v697_v1 }
  0x35   :  { %699 = vmatprep.subr.bf16.mxu0 %v760_v3 }
  0x38   :  { %701 = vmatpush3.bf16.msra.mxu0 %v700_v5 }
  0x39   :  { %702 = vmatprep.subr.bf16.mxu0 %v760_v3 }
  0x3c   :  { %704 = vmatpush3.bf16.msra.mxu0 %v703_v9 }
  0x3d   :  { %705 = vmatprep.subr.bf16.mxu0 %v760_v3 }
  0x40   :  { %707 = vmatpush3.bf16.msra.mxu0 %v706_v17 }
  0xf6   :  { %v123_v11 = vpop.f32.mrb[0].mxu0 }
  0xf7   :  { %v124_v12 = vadd.f32 %v424_v10, %v123_v11  ;;  %v530_v13 = vpop.f32.mrb[1].mxu0 }
  0xf9   :  { %v127_v14 = vmax.f32 %v124_v12, 0.0 }
  0xfb   :  { %564 = vmatmul.mubr.f32.vlgmr.msra.gmra.mrb[0].mxu1 %v127_v14 }
  0xfc   :  { %633 = vmatprep.mubr.msk.f32.mxu1 %vm761_vm0, %v762_v6  ;;  %v318_v6 = vld [vmem:[%s1080_s7 + $0x10] sm:$0xff]  ;;  %710 = vmatpush3.bf16.msra.mxu1 %v709_v20  ;;  %s736_s7 = scalar_lea.vmem %s417_s28, 128 }
  0xfd   :  { %v712_v22 = vpack.c.bf16 %v319_v21, %v318_v6  ;;  %711 = vmatprep.subr.bf16.mxu1 %v760_v3  ;;  %p737_p0 = scmp.ne.s32.totalorder %s417_s28, %s736_s7  ;;  %p742_p2 = scmp.lt.s32.totalorder %s736_s7, %s736_s7 }
  0xff   :  { %p743_p3 = por %p742_p2, %p741_p1 }
 0x100   :  { %713 = vmatpush3.bf16.msra.mxu1 %v712_v22 }
 0x101   :  { %714 = vmatprep.subr.bf16.mxu1 %v760_v3  ;;  %p744_p4 = pnand %p743_p3, %p737_p0 }
 0x104   :  { %716 = vmatpush3.bf16.msra.mxu1 %v715_v25 }
 0x105   :  { %717 = vmatprep.subr.bf16.mxu1 %v760_v3 }
 0x108   :  { %719 = vmatpush3.bf16.msra.mxu1 %v718_v28 }
 0x109   :  { %720 = vmatprep.subr.bf16.mxu1 %v760_v3 }
 0x10c   :  { %722 = vmatpush3.bf16.msra.mxu1 %v721_v31 }
 0x10d   :  { %723 = vmatprep.subr.bf16.mxu1 %v760_v3 }
 0x110   :  { %725 = vmatpush3.bf16.msra.mxu1 %v724_v34 }
 0x111   :  { %726 = vmatprep.subr.bf16.mxu1 %v760_v3 }
 0x114   :  { %728 = vmatpush3.bf16.msra.mxu1 %v727_v37 }
 0x115   :  { %729 = vmatprep.subr.bf16.mxu1 %v760_v3  ;;  %v426_v3 = vld [vmem:[%s1079_s6] ss:$0 sm:$0xff] }
 0x118   :  { %731 = vmatpush3.bf16.msra.mxu1 %v730_v45 }
 0x1ce   :  { %v217_v39 = vpop.f32.mrb[0].mxu1 }
 0x1cf   :  { %v218_v40 = vadd.f32 %v425_v38, %v217_v39  ;;  %v565_v41 = vpop.f32.mrb[1].mxu1 }
 0x1d1   :  { %v221_v42 = vmax.f32 %v218_v40, 0.0 }
 0x1d3   :  { %599 = vmatmul.mubr.f32.vlgmr.msra.gmra.mrb[2].mxu0 %v221_v42 }
 0x2a6   :  { %v311_v46 = vpop.f32.mrb[2].mxu0 }
 0x2a7   :  { %v312_v47 = vadd.f32 %v426_v3, %v311_v46  ;;  %v600_v48 = vpop.f32.mrb[3].mxu0 }
 0x2a9   :  { %v315_v49 = vmax.f32 %v312_v47, 0.0 }
 0x2ab   :  { %634 = vmatmul.mubr.f32.vlgmr.msra.gmra.mrb[2].mxu1 %v315_v49 }
 0x37e   :  { %v405_v51 = vpop.f32.mrb[2].mxu1 }
 0x37f   :  { %v406_v52 = vadd.f32 %v427_v50, %v405_v51  ;;  %v635_v53 = vpop.f32.mrb[3].mxu1 }
 0x381   :  { %409 = vst [vmem:[#allocation2] sm:$0xff] %v406_v52 }
 0x382   :  { %747 = shalt.err (!%p744_p4)
}
 0x383   :  { %s748_s30 = scalar_lea.hbm %s1082_s9, 128 }
 0x384   :  { %p749_p5 = scmp.ne.s32.totalorder %s1082_s9, %s748_s30  ;;  %p752_p6 = scmp.lt.u32.totalorder %s748_s30, %s1082_s9 }
 0x386   :  { %p754_p7 = pnand %p752_p6, %p749_p5 }
 0x388   :  { %757 = shalt.err (!%p754_p7)
}
 0x389   :  { %419 = dma.vmem_to_hbm [thread:$0]  %s417_s28, 128, %s1082_s9, [#allocation3]  }
 0x38a   :  { %758 = dma.done.wait [#allocation3], 128  }
 0x38b   :  { %759 = vsyncadd [#allocation3], 4294967168 }
 0x38c   :  { %423 = vsyncpa [#allocation3], 1 }

</bundles_post_ra>
